<compile_context>
chip_gen: v7x
topology: tpu7x:2x2x1
jax: 0.10.0
libtpu: 0.0.40
codegen_flags: <defaults>
</compile_context>

<pallas_src>
import functools

import jax
import jax.numpy as jnp
from jax import lax
from jax.experimental import pallas as pl
from jax.experimental.pallas import tpu as pltpu


# ----------------------------------------------------------------------------
# CSAM_Module
# ----------------------------------------------------------------------------
def _csam_kernel(w_ref, b_ref, g_ref, x_ref, o_ref, sp_ref, cp_ref, *, W):
    # w_ref : (27,) f32 SMEM  -- flattened 3x3x3 Conv3d weight, index = dc*9 + dh*3 + dw
    # b_ref : (1,)  f32 SMEM  -- Conv3d bias
    # g_ref : (1,)  f32 SMEM  -- gamma
    # x_ref : (1, C, H*W) VMEM -- one batch element, spatial dims flattened on lanes
    # o_ref : (1, C, H*W) VMEM
    # sp_ref: (C, H*W + 2*(W+1)) f32 VMEM scratch -- lane-padded copy of x (spatial halo)
    # cp_ref: (C + 2, H*W)       f32 VMEM scratch -- zero-bordered buffer (channel halo)
    C, HW = x_ref.shape[1], x_ref.shape[2]
    P = W + 1                                  # lane padding covers shifts up to +-(W+1)

    x2 = x_ref[0].astype(jnp.float32)          # (C, HW) f32 compute (v5e-safe)

    # ---- build the spatially zero-padded copy of x in VMEM (no HBM traffic) ----
    zpad = jnp.zeros((C, P), jnp.float32)
    sp_ref[:, 0:P] = zpad
    sp_ref[:, P + HW:P + HW + P] = zpad
    sp_ref[:, P:P + HW] = x2

    # Column masks: a lane shift of +-1 must not wrap across image rows.
    w_id = jax.lax.broadcasted_iota(jnp.int32, (C, HW), 1) % W
    ok_left = w_id >= 1                        # (w-1) neighbour exists
    ok_right = w_id <= W - 2                   # (w+1) neighbour exists

    # ---- 9 spatially shifted planes: Z[oh][ow][c, h*W+w] = x[c, h+oh, w+ow] (0 if OOB) ----
    planes = []
    for oh in (-1, 0, 1):
        row = []
        for ow in (-1, 0, 1):
            d = oh * W + ow
            z = sp_ref[:, P + d:P + d + HW]    # lane-offset read of the padded copy
            if ow == -1:
                z = jnp.where(ok_left, z, 0.0)
            elif ow == 1:
                z = jnp.where(ok_right, z, 0.0)
            row.append(z)
        planes.append(row)

    # ---- 27 weighted taps, factored over the channel (depth) offset ----
    # u[dc] = sum_{dh,dw} w[dc,dh,dw] * Z[dh-1][dw-1]        (dc = 0,1,2)
    u = []
    for dc in range(3):
        acc = None
        for dh in range(3):
            for dw in range(3):
                term = w_ref[dc * 9 + dh * 3 + dw] * planes[dh][dw]
                acc = term if acc is None else acc + term
        u.append(acc)

    # ---- channel (depth) halo: conv[c] = u[0][c-1] + u[1][c] + u[2][c+1] (zero OOB) ----
    zrow = jnp.zeros((1, HW), jnp.float32)
    cp_ref[0:1, :] = zrow
    cp_ref[C + 1:C + 2, :] = zrow
    cp_ref[1:C + 1, :] = u[0]
    down = cp_ref[0:C, :]                      # u[0] shifted down (zero at c = 0)
    cp_ref[1:C + 1, :] = u[2]
    up = cp_ref[2:C + 2, :]                    # u[2] shifted up (zero at c = C-1)

    conv = down + u[1] + up + b_ref[0]

    # ---- attention + residual ----
    att = g_ref[0] * jax.nn.sigmoid(conv)
    o_ref[0] = (x2 * att + x2).astype(o_ref.dtype)


def csam_forward(x, conv_w, conv_b, gamma):
    """x: (B, C, H, W); conv_w: (1,1,3,3,3); conv_b: (1,); gamma: (1,)."""
    B, C, H, W = x.shape
    HW = H * W
    xf = x.reshape(B, C, HW)                   # free reshape; lane axis = H*W
    w_flat = conv_w.reshape(27).astype(jnp.float32)
    smem = pl.BlockSpec(memory_space=pltpu.MemorySpace.SMEM)
    out = pl.pallas_call(
        functools.partial(_csam_kernel, W=W),
        out_shape=jax.ShapeDtypeStruct((B, C, HW), x.dtype),
        grid=(B,),
        in_specs=[
            smem,                              # conv weight (flattened)
            smem,                              # conv bias
            smem,                              # gamma
            pl.BlockSpec((1, C, HW), lambda b: (b, 0, 0)),
        ],
        out_specs=pl.BlockSpec((1, C, HW), lambda b: (b, 0, 0)),
        scratch_shapes=[
            pltpu.VMEM((C, HW + 2 * (W + 1)), jnp.float32),   # spatial-halo copy of x
            pltpu.VMEM((C + 2, HW), jnp.float32),             # channel-halo buffer
        ],
        compiler_params=pltpu.CompilerParams(
            dimension_semantics=("parallel",),
            vmem_limit_bytes=32 * 1024 * 1024,
        ),
    )(w_flat, conv_b.astype(jnp.float32), gamma.astype(jnp.float32), xf)
    return out.reshape(B, C, H, W)


def csam_reference(x, conv_w, conv_b, gamma):
    """Pure-JAX reference matching the PyTorch CSAM_Module forward."""
    B, C, H, W = x.shape
    out = x[:, None]                           # (B, 1, C, H, W)
    conv = jax.lax.conv_general_dilated(
        out, conv_w,
        window_strides=(1, 1, 1),
        padding=((1, 1), (1, 1), (1, 1)),
        dimension_numbers=("NCDHW", "OIDHW", "NCDHW"),
    ) + conv_b.reshape(1, 1, 1, 1, 1)
    att = gamma[0] * jax.nn.sigmoid(conv)
    att = att.reshape(B, C, H, W)              # == .view(B, -1, H, W)
    return x * att + x


# ----------------------------------------------------------------------------
# LAM_Module
# ----------------------------------------------------------------------------
def _lam_kernel(g_ref, x_ref, o_ref):
    # g_ref: (1,) f32 SMEM  -- gamma
    # x_ref: (1, N, D) VMEM -- one batch element, D = C*H*W (lane-dense slab)
    # o_ref: (1, N, D) VMEM
    x = x_ref[0].astype(jnp.float32)                              # (N, D)

    # energy[i, j] = <x_i, x_j>  (q @ k^T on the MXU, contracted over lanes)
    energy = lax.dot_general(
        x, x, dimension_numbers=(((1,), (1,)), ((), ())),
        preferred_element_type=jnp.float32)                       # (N, N)

    energy_new = jnp.max(energy, axis=-1, keepdims=True) - energy
    m = jnp.max(energy_new, axis=-1, keepdims=True)
    e = jnp.exp(energy_new - m)                                   # EUP
    att = e / jnp.sum(e, axis=-1, keepdims=True)                  # (N, N)

    out = jnp.dot(att, x, preferred_element_type=jnp.float32)     # (N, D)
    o_ref[0] = (g_ref[0] * out + x).astype(o_ref.dtype)


def lam_forward(x, gamma):
    """x: (B, N, C, H, W); gamma: (1,). Returns (B, N*C, H, W)."""
    B, N, C, H, W = x.shape
    D = C * H * W
    xf = x.reshape(B, N, D)                    # free reshape; lane axis = C*H*W
    smem = pl.BlockSpec(memory_space=pltpu.MemorySpace.SMEM)
    out = pl.pallas_call(
        _lam_kernel,
        out_shape=jax.ShapeDtypeStruct((B, N, D), x.dtype),
        grid=(B,),
        in_specs=[
            smem,                              # gamma
            pl.BlockSpec((1, N, D), lambda b: (b, 0, 0)),
        ],
        out_specs=pl.BlockSpec((1, N, D), lambda b: (b, 0, 0)),
        compiler_params=pltpu.CompilerParams(
            dimension_semantics=("parallel",),
            vmem_limit_bytes=32 * 1024 * 1024,
        ),
    )(gamma.astype(jnp.float32), xf)
    return out.reshape(B, N * C, H, W)


def lam_reference(x, gamma):
    """Pure-JAX reference matching the PyTorch LAM_Module forward."""
    B, N, C, H, W = x.shape
    q = x.reshape(B, N, -1).astype(jnp.float32)
    energy = jnp.einsum("bnd,bmd->bnm", q, q,
                        precision=lax.Precision.HIGHEST)
    energy_new = jnp.max(energy, axis=-1, keepdims=True) - energy
    att = jax.nn.softmax(energy_new, axis=-1)
    out = jnp.einsum("bnm,bmd->bnd", att, q,
                     precision=lax.Precision.HIGHEST)
    out = out.reshape(B, N, C, H, W)
    out = gamma[0] * out + x
    return out.reshape(B, N * C, H, W).astype(x.dtype)


# ----------------------------------------------------------------------------
if __name__ == "__main__":
    key = jax.random.PRNGKey(0)
    kx, kw, kb, kl = jax.random.split(key, 4)

    # ---- CSAM_Module check: x (B, C, H, W) ----
    B, C, H, W = 2, 4, 16, 16
    x = jax.random.normal(kx, (B, C, H, W), dtype=jnp.float32)

    # Parameter init with shapes from nn.Conv3d(1, 1, 3, 1, 1):
    fan_in = 1 * 3 * 3 * 3
    bound = 1.0 / jnp.sqrt(jnp.float32(fan_in))
    conv_w = jax.random.uniform(kw, (1, 1, 3, 3, 3), jnp.float32, -bound, bound)
    conv_b = jax.random.uniform(kb, (1,), jnp.float32, -bound, bound)
    # The module initializes gamma to 0 (output would trivially equal x);
    # use a nonzero value so the attention paths are actually exercised.
    gamma = jnp.full((1,), 0.5, dtype=jnp.float32)

    out_csam = jax.block_until_ready(csam_forward(x, conv_w, conv_b, gamma))
    ref_csam = csam_reference(x, conv_w, conv_b, gamma)
    assert out_csam.shape == (B, C, H, W)
    assert jnp.allclose(out_csam, ref_csam, rtol=1e-5, atol=1e-5), \
        f"CSAM max abs err {jnp.max(jnp.abs(out_csam - ref_csam))}"

    # ---- LAM_Module check: x (B, N, C, H, W), N = number of RFDB outputs ----
    N = 4
    xl = jax.random.normal(kl, (B, N, C, H, W), dtype=jnp.float32)
    out_lam = jax.block_until_ready(lam_forward(xl, gamma))
    ref_lam = lam_reference(xl, gamma)
    assert out_lam.shape == (B, N * C, H, W)
    # Summation-order differences (MXU vs XLA reduction) get amplified through
    # the softmax exponent; 5e-3 still cleanly separates a correct kernel
    # (~1e-4 err) from a wrong one (O(1) err).
    assert jnp.allclose(out_lam, ref_lam, rtol=5e-3, atol=5e-3), \
        f"LAM max abs err {jnp.max(jnp.abs(out_lam - ref_lam))}"

    print("KERNEL_OK")
</pallas_src>

<mosaic_0001>
module attributes {stable_mosaic.version = 11 : i64} {
  func.func @_csam_kernel(%arg0: i32, %arg1: memref<27xf32, #tpu.memory_space<smem>>, %arg2: memref<1xf32, #tpu.memory_space<smem>>, %arg3: memref<1xf32, #tpu.memory_space<smem>>, %arg4: memref<1x4x256xf32, #tpu.memory_space<vmem>>, %arg5: memref<1x4x256xf32, #tpu.memory_space<vmem>>, %arg6: memref<4x290xf32, #tpu.memory_space<vmem>>, %arg7: memref<6x256xf32, #tpu.memory_space<vmem>>) attributes {dimension_semantics = [#tpu.dimension_semantics<parallel>], iteration_bounds = array<i64: 2>, scalar_prefetch = 0 : i64, scratch_operands = 2 : i64, tpu.core_type = #tpu.core_type<tc>, window_params = [{transform_indices = @transform_0, window_bounds = array<i64: 27>}, {transform_indices = @transform_1, window_bounds = array<i64: 1>}, {transform_indices = @transform_2, window_bounds = array<i64: 1>}, {transform_indices = @transform_3, window_bounds = array<i64: 1, 4, 256>}, {transform_indices = @transform_4, window_bounds = array<i64: 1, 4, 256>}]} {
    %c0 = arith.constant 0 : index
    %c0_0 = arith.constant 0 : index
    %c0_1 = arith.constant 0 : index
    %0 = vector.load %arg4[%c0, %c0_0, %c0_1] : memref<1x4x256xf32, #tpu.memory_space<vmem>>, vector<1x4x256xf32>
    %1 = vector.shape_cast %0 : vector<1x4x256xf32> to vector<4x256xf32>
    %cst = arith.constant 0.000000e+00 : f32
    %2 = vector.broadcast %cst : f32 to vector<4x17xf32>
    %c0_2 = arith.constant 0 : index
    %c0_3 = arith.constant 0 : index
    %3 = vector.load %arg6[%c0_2, %c0_3] : memref<4x290xf32, #tpu.memory_space<vmem>>, vector<4x17xf32>
    tpu.vector_store %arg6[%c0_2, %c0_3], %2 {strides = array<i32>} : memref<4x290xf32, #tpu.memory_space<vmem>>, vector<4x17xf32>,
    %c0_4 = arith.constant 0 : index
    %c273 = arith.constant 273 : index
    %4 = vector.load %arg6[%c0_4, %c273] : memref<4x290xf32, #tpu.memory_space<vmem>>, vector<4x17xf32>
    tpu.vector_store %arg6[%c0_4, %c273], %2 {strides = array<i32>} : memref<4x290xf32, #tpu.memory_space<vmem>>, vector<4x17xf32>,
    %c0_5 = arith.constant 0 : index
    %c17 = arith.constant 17 : index
    %5 = vector.load %arg6[%c0_5, %c17] : memref<4x290xf32, #tpu.memory_space<vmem>>, vector<4x256xf32>
    tpu.vector_store %arg6[%c0_5, %c17], %1 {strides = array<i32>} : memref<4x290xf32, #tpu.memory_space<vmem>>, vector<4x256xf32>,
    %6 = tpu.iota {dimensions = array<i32: 1>} : vector<4x256xi32>
    %c16_i32 = arith.constant 16 : i32
    %c0_i32 = arith.constant 0 : i32
    %7 = arith.cmpi eq, %c16_i32, %c0_i32 : i32
    %c1_i32 = arith.constant 1 : i32
    %8 = arith.select %7, %c1_i32, %c16_i32 : i32
    %9 = vector.broadcast %8 : i32 to vector<4x256xi32>
    %10 = arith.remsi %6, %9 : vector<4x256xi32>
    %c0_i32_6 = arith.constant 0 : i32
    %11 = vector.broadcast %c0_i32_6 : i32 to vector<4x256xi32>
    %12 = arith.cmpi ne, %10, %11 : vector<4x256xi32>
    %c0_i32_7 = arith.constant 0 : i32
    %13 = vector.broadcast %c0_i32_7 : i32 to vector<4x256xi32>
    %14 = arith.cmpi slt, %10, %13 : vector<4x256xi32>
    %c0_i32_8 = arith.constant 0 : i32
    %15 = arith.cmpi slt, %8, %c0_i32_8 : i32
    %16 = vector.broadcast %15 : i1 to vector<4x256xi1>
    %17 = vector.broadcast %16 : vector<4x256xi1> to vector<4x256xi1>
    %18 = arith.xori %14, %17 : vector<4x256xi1>
    %19 = arith.andi %18, %12 : vector<4x256xi1>
    %20 = vector.broadcast %8 : i32 to vector<4x256xi32>
    %21 = arith.addi %10, %20 : vector<4x256xi32>
    %22 = arith.select %19, %21, %10 : vector<4x256xi1>, vector<4x256xi32>
    %c1_i32_9 = arith.constant 1 : i32
    %23 = vector.broadcast %c1_i32_9 : i32 to vector<4x256xi32>
    %24 = arith.cmpi sge, %22, %23 : vector<4x256xi32>
    %c14_i32 = arith.constant 14 : i32
    %25 = vector.broadcast %c14_i32 : i32 to vector<4x256xi32>
    %26 = arith.cmpi sle, %22, %25 : vector<4x256xi32>
    %c0_10 = arith.constant 0 : index
    %c0_11 = arith.constant 0 : index
    %27 = vector.load %arg6[%c0_10, %c0_11] : memref<4x290xf32, #tpu.memory_space<vmem>>, vector<4x256xf32>
    %cst_12 = arith.constant 0.000000e+00 : f32
    %28 = vector.broadcast %cst_12 : f32 to vector<4x256xf32>
    %29 = arith.select %24, %27, %28 : vector<4x256xi1>, vector<4x256xf32>
    %c0_13 = arith.constant 0 : index
    %c1 = arith.constant 1 : index
    %30 = vector.load %arg6[%c0_13, %c1] : memref<4x290xf32, #tpu.memory_space<vmem>>, vector<4x256xf32>
    %c0_14 = arith.constant 0 : index
    %c2 = arith.constant 2 : index
    %31 = vector.load %arg6[%c0_14, %c2] : memref<4x290xf32, #tpu.memory_space<vmem>>, vector<4x256xf32>
    %cst_15 = arith.constant 0.000000e+00 : f32
    %32 = vector.broadcast %cst_15 : f32 to vector<4x256xf32>
    %33 = arith.select %26, %31, %32 : vector<4x256xi1>, vector<4x256xf32>
    %c0_16 = arith.constant 0 : index
    %c16 = arith.constant 16 : index
    %34 = vector.load %arg6[%c0_16, %c16] : memref<4x290xf32, #tpu.memory_space<vmem>>, vector<4x256xf32>
    %cst_17 = arith.constant 0.000000e+00 : f32
    %35 = vector.broadcast %cst_17 : f32 to vector<4x256xf32>
    %36 = arith.select %24, %34, %35 : vector<4x256xi1>, vector<4x256xf32>
    %c0_18 = arith.constant 0 : index
    %c17_19 = arith.constant 17 : index
    %37 = vector.load %arg6[%c0_18, %c17_19] : memref<4x290xf32, #tpu.memory_space<vmem>>, vector<4x256xf32>
    %c0_20 = arith.constant 0 : index
    %c18 = arith.constant 18 : index
    %38 = vector.load %arg6[%c0_20, %c18] : memref<4x290xf32, #tpu.memory_space<vmem>>, vector<4x256xf32>
    %cst_21 = arith.constant 0.000000e+00 : f32
    %39 = vector.broadcast %cst_21 : f32 to vector<4x256xf32>
    %40 = arith.select %26, %38, %39 : vector<4x256xi1>, vector<4x256xf32>
    %c0_22 = arith.constant 0 : index
    %c32 = arith.constant 32 : index
    %41 = vector.load %arg6[%c0_22, %c32] : memref<4x290xf32, #tpu.memory_space<vmem>>, vector<4x256xf32>
    %cst_23 = arith.constant 0.000000e+00 : f32
    %42 = vector.broadcast %cst_23 : f32 to vector<4x256xf32>
    %43 = arith.select %24, %41, %42 : vector<4x256xi1>, vector<4x256xf32>
    %c0_24 = arith.constant 0 : index
    %c33 = arith.constant 33 : index
    %44 = vector.load %arg6[%c0_24, %c33] : memref<4x290xf32, #tpu.memory_space<vmem>>, vector<4x256xf32>
    %c0_25 = arith.constant 0 : index
    %c34 = arith.constant 34 : index
    %45 = vector.load %arg6[%c0_25, %c34] : memref<4x290xf32, #tpu.memory_space<vmem>>, vector<4x256xf32>
    %cst_26 = arith.constant 0.000000e+00 : f32
    %46 = vector.broadcast %cst_26 : f32 to vector<4x256xf32>
    %47 = arith.select %26, %45, %46 : vector<4x256xi1>, vector<4x256xf32>
    %c0_27 = arith.constant 0 : index
    %48 = memref.load %arg1[%c0_27] : memref<27xf32, #tpu.memory_space<smem>>
    %49 = vector.broadcast %48 : f32 to vector<4x256xf32>
    %50 = arith.mulf %49, %29 : vector<4x256xf32>
    %c1_28 = arith.constant 1 : index
    %51 = memref.load %arg1[%c1_28] : memref<27xf32, #tpu.memory_space<smem>>
    %52 = vector.broadcast %51 : f32 to vector<4x256xf32>
    %53 = arith.mulf %52, %30 : vector<4x256xf32>
    %54 = arith.addf %50, %53 : vector<4x256xf32>
    %c2_29 = arith.constant 2 : index
    %55 = memref.load %arg1[%c2_29] : memref<27xf32, #tpu.memory_space<smem>>
    %56 = vector.broadcast %55 : f32 to vector<4x256xf32>
    %57 = arith.mulf %56, %33 : vector<4x256xf32>
    %58 = arith.addf %54, %57 : vector<4x256xf32>
    %c3 = arith.constant 3 : index
    %59 = memref.load %arg1[%c3] : memref<27xf32, #tpu.memory_space<smem>>
    %60 = vector.broadcast %59 : f32 to vector<4x256xf32>
    %61 = arith.mulf %60, %36 : vector<4x256xf32>
    %62 = arith.addf %58, %61 : vector<4x256xf32>
    %c4 = arith.constant 4 : index
    %63 = memref.load %arg1[%c4] : memref<27xf32, #tpu.memory_space<smem>>
    %64 = vector.broadcast %63 : f32 to vector<4x256xf32>
    %65 = arith.mulf %64, %37 : vector<4x256xf32>
    %66 = arith.addf %62, %65 : vector<4x256xf32>
    %c5 = arith.constant 5 : index
    %67 = memref.load %arg1[%c5] : memref<27xf32, #tpu.memory_space<smem>>
    %68 = vector.broadcast %67 : f32 to vector<4x256xf32>
    %69 = arith.mulf %68, %40 : vector<4x256xf32>
    %70 = arith.addf %66, %69 : vector<4x256xf32>
    %c6 = arith.constant 6 : index
    %71 = memref.load %arg1[%c6] : memref<27xf32, #tpu.memory_space<smem>>
    %72 = vector.broadcast %71 : f32 to vector<4x256xf32>
    %73 = arith.mulf %72, %43 : vector<4x256xf32>
    %74 = arith.addf %70, %73 : vector<4x256xf32>
    %c7 = arith.constant 7 : index
    %75 = memref.load %arg1[%c7] : memref<27xf32, #tpu.memory_space<smem>>
    %76 = vector.broadcast %75 : f32 to vector<4x256xf32>
    %77 = arith.mulf %76, %44 : vector<4x256xf32>
    %78 = arith.addf %74, %77 : vector<4x256xf32>
    %c8 = arith.constant 8 : index
    %79 = memref.load %arg1[%c8] : memref<27xf32, #tpu.memory_space<smem>>
    %80 = vector.broadcast %79 : f32 to vector<4x256xf32>
    %81 = arith.mulf %80, %47 : vector<4x256xf32>
    %82 = arith.addf %78, %81 : vector<4x256xf32>
    %c9 = arith.constant 9 : index
    %83 = memref.load %arg1[%c9] : memref<27xf32, #tpu.memory_space<smem>>
    %84 = vector.broadcast %83 : f32 to vector<4x256xf32>
    %85 = arith.mulf %84, %29 : vector<4x256xf32>
    %c10 = arith.constant 10 : index
    %86 = memref.load %arg1[%c10] : memref<27xf32, #tpu.memory_space<smem>>
    %87 = vector.broadcast %86 : f32 to vector<4x256xf32>
    %88 = arith.mulf %87, %30 : vector<4x256xf32>
    %89 = arith.addf %85, %88 : vector<4x256xf32>
    %c11 = arith.constant 11 : index
    %90 = memref.load %arg1[%c11] : memref<27xf32, #tpu.memory_space<smem>>
    %91 = vector.broadcast %90 : f32 to vector<4x256xf32>
    %92 = arith.mulf %91, %33 : vector<4x256xf32>
    %93 = arith.addf %89, %92 : vector<4x256xf32>
    %c12 = arith.constant 12 : index
    %94 = memref.load %arg1[%c12] : memref<27xf32, #tpu.memory_space<smem>>
    %95 = vector.broadcast %94 : f32 to vector<4x256xf32>
    %96 = arith.mulf %95, %36 : vector<4x256xf32>
    %97 = arith.addf %93, %96 : vector<4x256xf32>
    %c13 = arith.constant 13 : index
    %98 = memref.load %arg1[%c13] : memref<27xf32, #tpu.memory_space<smem>>
    %99 = vector.broadcast %98 : f32 to vector<4x256xf32>
    %100 = arith.mulf %99, %37 : vector<4x256xf32>
    %101 = arith.addf %97, %100 : vector<4x256xf32>
    %c14 = arith.constant 14 : index
    %102 = memref.load %arg1[%c14] : memref<27xf32, #tpu.memory_space<smem>>
    %103 = vector.broadcast %102 : f32 to vector<4x256xf32>
    %104 = arith.mulf %103, %40 : vector<4x256xf32>
    %105 = arith.addf %101, %104 : vector<4x256xf32>
    %c15 = arith.constant 15 : index
    %106 = memref.load %arg1[%c15] : memref<27xf32, #tpu.memory_space<smem>>
    %107 = vector.broadcast %106 : f32 to vector<4x256xf32>
    %108 = arith.mulf %107, %43 : vector<4x256xf32>
    %109 = arith.addf %105, %108 : vector<4x256xf32>
    %c16_30 = arith.constant 16 : index
    %110 = memref.load %arg1[%c16_30] : memref<27xf32, #tpu.memory_space<smem>>
    %111 = vector.broadcast %110 : f32 to vector<4x256xf32>
    %112 = arith.mulf %111, %44 : vector<4x256xf32>
    %113 = arith.addf %109, %112 : vector<4x256xf32>
    %c17_31 = arith.constant 17 : index
    %114 = memref.load %arg1[%c17_31] : memref<27xf32, #tpu.memory_space<smem>>
    %115 = vector.broadcast %114 : f32 to vector<4x256xf32>
    %116 = arith.mulf %115, %47 : vector<4x256xf32>
    %117 = arith.addf %113, %116 : vector<4x256xf32>
    %c18_32 = arith.constant 18 : index
    %118 = memref.load %arg1[%c18_32] : memref<27xf32, #tpu.memory_space<smem>>
    %119 = vector.broadcast %118 : f32 to vector<4x256xf32>
    %120 = arith.mulf %119, %29 : vector<4x256xf32>
    %c19 = arith.constant 19 : index
    %121 = memref.load %arg1[%c19] : memref<27xf32, #tpu.memory_space<smem>>
    %122 = vector.broadcast %121 : f32 to vector<4x256xf32>
    %123 = arith.mulf %122, %30 : vector<4x256xf32>
    %124 = arith.addf %120, %123 : vector<4x256xf32>
    %c20 = arith.constant 20 : index
    %125 = memref.load %arg1[%c20] : memref<27xf32, #tpu.memory_space<smem>>
    %126 = vector.broadcast %125 : f32 to vector<4x256xf32>
    %127 = arith.mulf %126, %33 : vector<4x256xf32>
    %128 = arith.addf %124, %127 : vector<4x256xf32>
    %c21 = arith.constant 21 : index
    %129 = memref.load %arg1[%c21] : memref<27xf32, #tpu.memory_space<smem>>
    %130 = vector.broadcast %129 : f32 to vector<4x256xf32>
    %131 = arith.mulf %130, %36 : vector<4x256xf32>
    %132 = arith.addf %128, %131 : vector<4x256xf32>
    %c22 = arith.constant 22 : index
    %133 = memref.load %arg1[%c22] : memref<27xf32, #tpu.memory_space<smem>>
    %134 = vector.broadcast %133 : f32 to vector<4x256xf32>
    %135 = arith.mulf %134, %37 : vector<4x256xf32>
    %136 = arith.addf %132, %135 : vector<4x256xf32>
    %c23 = arith.constant 23 : index
    %137 = memref.load %arg1[%c23] : memref<27xf32, #tpu.memory_space<smem>>
    %138 = vector.broadcast %137 : f32 to vector<4x256xf32>
    %139 = arith.mulf %138, %40 : vector<4x256xf32>
    %140 = arith.addf %136, %139 : vector<4x256xf32>
    %c24 = arith.constant 24 : index
    %141 = memref.load %arg1[%c24] : memref<27xf32, #tpu.memory_space<smem>>
    %142 = vector.broadcast %141 : f32 to vector<4x256xf32>
    %143 = arith.mulf %142, %43 : vector<4x256xf32>
    %144 = arith.addf %140, %143 : vector<4x256xf32>
    %c25 = arith.constant 25 : index
    %145 = memref.load %arg1[%c25] : memref<27xf32, #tpu.memory_space<smem>>
    %146 = vector.broadcast %145 : f32 to vector<4x256xf32>
    %147 = arith.mulf %146, %44 : vector<4x256xf32>
    %148 = arith.addf %144, %147 : vector<4x256xf32>
    %c26 = arith.constant 26 : index
    %149 = memref.load %arg1[%c26] : memref<27xf32, #tpu.memory_space<smem>>
    %150 = vector.broadcast %149 : f32 to vector<4x256xf32>
    %151 = arith.mulf %150, %47 : vector<4x256xf32>
    %152 = arith.addf %148, %151 : vector<4x256xf32>
    %cst_33 = arith.constant 0.000000e+00 : f32
    %153 = vector.broadcast %cst_33 : f32 to vector<1x256xf32>
    %c0_34 = arith.constant 0 : index
    %c0_35 = arith.constant 0 : index
    %154 = vector.load %arg7[%c0_34, %c0_35] : memref<6x256xf32, #tpu.memory_space<vmem>>, vector<1x256xf32>
    tpu.vector_store %arg7[%c0_34, %c0_35], %153 {strides = array<i32>} : memref<6x256xf32, #tpu.memory_space<vmem>>, vector<1x256xf32>,
    %c5_36 = arith.constant 5 : index
    %c0_37 = arith.constant 0 : index
    %155 = vector.load %arg7[%c5_36, %c0_37] : memref<6x256xf32, #tpu.memory_space<vmem>>, vector<1x256xf32>
    tpu.vector_store %arg7[%c5_36, %c0_37], %153 {strides = array<i32>} : memref<6x256xf32, #tpu.memory_space<vmem>>, vector<1x256xf32>,
    %c1_38 = arith.constant 1 : index
    %c0_39 = arith.constant 0 : index
    %156 = vector.load %arg7[%c1_38, %c0_39] : memref<6x256xf32, #tpu.memory_space<vmem>>, vector<4x256xf32>
    tpu.vector_store %arg7[%c1_38, %c0_39], %82 {strides = array<i32>} : memref<6x256xf32, #tpu.memory_space<vmem>>, vector<4x256xf32>,
    %c0_40 = arith.constant 0 : index
    %c0_41 = arith.constant 0 : index
    %157 = vector.load %arg7[%c0_40, %c0_41] : memref<6x256xf32, #tpu.memory_space<vmem>>, vector<4x256xf32>
    %c1_42 = arith.constant 1 : index
    %c0_43 = arith.constant 0 : index
    %158 = vector.load %arg7[%c1_42, %c0_43] : memref<6x256xf32, #tpu.memory_space<vmem>>, vector<4x256xf32>
    tpu.vector_store %arg7[%c1_42, %c0_43], %152 {strides = array<i32>} : memref<6x256xf32, #tpu.memory_space<vmem>>, vector<4x256xf32>,
    %c2_44 = arith.constant 2 : index
    %c0_45 = arith.constant 0 : index
    %159 = vector.load %arg7[%c2_44, %c0_45] : memref<6x256xf32, #tpu.memory_space<vmem>>, vector<4x256xf32>
    %160 = arith.addf %157, %117 : vector<4x256xf32>
    %161 = arith.addf %160, %159 : vector<4x256xf32>
    %c0_46 = arith.constant 0 : index
    %162 = memref.load %arg2[%c0_46] : memref<1xf32, #tpu.memory_space<smem>>
    %163 = vector.broadcast %162 : f32 to vector<4x256xf32>
    %164 = arith.addf %161, %163 : vector<4x256xf32>
    %c0_47 = arith.constant 0 : index
    %165 = memref.load %arg3[%c0_47] : memref<1xf32, #tpu.memory_space<smem>>
    %166 = arith.negf %164 : vector<4x256xf32>
    %167 = math.exp %166 : vector<4x256xf32>
    %cst_48 = arith.constant 1.000000e+00 : f32
    %168 = vector.broadcast %cst_48 : f32 to vector<4x256xf32>
    %169 = arith.addf %168, %167 : vector<4x256xf32>
    %170 = arith.divf %168, %169 : vector<4x256xf32>
    %171 = vector.broadcast %165 : f32 to vector<4x256xf32>
    %172 = arith.mulf %171, %170 : vector<4x256xf32>
    %173 = arith.mulf %1, %172 : vector<4x256xf32>
    %174 = arith.addf %173, %1 : vector<4x256xf32>
    %c0_49 = arith.constant 0 : index
    %c0_50 = arith.constant 0 : index
    %c0_51 = arith.constant 0 : index
    %175 = vector.load %arg5[%c0_49, %c0_50, %c0_51] : memref<1x4x256xf32, #tpu.memory_space<vmem>>, vector<1x4x256xf32>
    %176 = vector.shape_cast %175 : vector<1x4x256xf32> to vector<4x256xf32>
    %177 = vector.shape_cast %174 : vector<4x256xf32> to vector<1x4x256xf32>
    tpu.vector_store %arg5[%c0_49, %c0_50, %c0_51], %177 {strides = array<i32>} : memref<1x4x256xf32, #tpu.memory_space<vmem>>, vector<1x4x256xf32>,
    return
  }
  func.func @transform_0(%arg0: i32) -> i32 {
    %c0_i32 = arith.constant 0 : i32
    %c0_i32_0 = arith.constant 0 : i32
    return %c0_i32 : i32
  }
  func.func @transform_1(%arg0: i32) -> i32 {
    %c0_i32 = arith.constant 0 : i32
    %c0_i32_0 = arith.constant 0 : i32
    return %c0_i32 : i32
  }
  func.func @transform_2(%arg0: i32) -> i32 {
    %c0_i32 = arith.constant 0 : i32
    %c0_i32_0 = arith.constant 0 : i32
    return %c0_i32 : i32
  }
  func.func @transform_3(%arg0: i32) -> (i32, i32, i32) {
    %c0_i32 = arith.constant 0 : i32
    %c0_i32_0 = arith.constant 0 : i32
    %c0_i32_1 = arith.constant 0 : i32
    return %arg0, %c0_i32, %c0_i32_0 : i32, i32, i32
  }
  func.func @transform_4(%arg0: i32) -> (i32, i32, i32) {
    %c0_i32 = arith.constant 0 : i32
    %c0_i32_0 = arith.constant 0 : i32
    %c0_i32_1 = arith.constant 0 : i32
    return %arg0, %c0_i32, %c0_i32_0 : i32, i32, i32
  }
}

</mosaic_0001>

<bundles_post_ra>
// kernel: tpu_custom_call.1
= control target key start
LH: loop header
LB: loop body
LE: loop exit
PB: predicated region body
PF: predicated region fallthrough
CT: control target
= control target key end

     0   :  { %s1612_s0 = inlined_call_operand.vmem [shape: f32[27], index: 0, kind: input, shape index: {}]   ;;  %s1613_s1 = inlined_call_operand.<no memory space> [shape: f32[1], index: 1, kind: input, shape index: {}]   ;;  %s1614_s2 = inlined_call_operand.<no memory space> [shape: f32[1], index: 2, kind: input, shape index: {}]   ;;  %s1615_s3 = inlined_call_operand.hbm [shape: f32[2,4,256], index: 3, kind: input, shape index: {}]   ;;  %s1616_s4 = inlined_call_operand.hbm [shape: f32[2,4,256], index: 4, kind: output, shape index: {}]  }
   0x1   :  { %9 = sst [smem:[#allocation4]] %s1613_s1 }
   0x2   :  { %10 = sst [smem:[#allocation5]] %s1614_s2 }
   0x3   :  { %11 = vsyncpa [#allocation9], 0 }
   0x4   :  { %12 = vsyncpa [#allocation7], 0 }
   0x5   :  { %14 = vsyncpa [#allocation7 + $0x1], 0 }
   0x6   :  { %15 = vsyncpa [#allocation8], 0 }
   0x7   :  { %17 = vsyncpa [#allocation8 + $0x1], 0  ;;  %s1074_s19 = smov 0   ;;  %s1076_s20 = smov 0  }
   0x8   :  { %s1078_s21 = smov 0   ;;  %s1080_s22 = smov 0  }
   0x9 LB: > { %s1095_s1 = sadd.s32 4294967295, %s1028_s22   ;;  %s791_s2 = sadd.s32 4294967294, %s1028_s22   ;;  %s1028_s22 = sphi %s1080_s22, %s1645_s22   ;;  %s1024_s21 = sphi %s1078_s21, %s1644_s21   ;;  %s1020_s20 = sphi %s1076_s20, %s1643_s20   ;;  %s1016_s19 = sphi %s1074_s19, %s1642_s19  }
   0xa   : > { %p106_p0 = scmp.ne.s32.totalorder %s1020_s20, %s1016_s19  ;;  %p1617_p1 = scmp.eq.s32.totalorder %s1095_s1, 0 }
   0xb   : > { %p136_p3 = scmp.eq.s32.totalorder %s791_s2, 1  ;;  %p792_p5 = scmp.ge.s32.totalorder %s1028_s22, 1 }
   0xc   : > { %p1104_p4 = por %p1617_p1, %p106_p0  ;;  %p143_p7 = scmp.lt.s32.totalorder %s1028_s22, 3 }
   0xd   : > { %p1109_p6 = por %p136_p3, %p106_p0  ;;  %s156_s27 = sshll.u32 %s1612_s0, 4  ;;  %s157_s27 = int_to_ptr.vmem [resolvable:$true] %s156_s27 }
   0xe   : > { %s1620_s23 = scalar_select %p1104_p4, 1, 0 }
   0xf   : > { %s1621_s24 = scalar_select %p1109_p6, 1, 0 }
  0x10   : > { %p1117_p8 = pnand %p792_p5, %p143_p7  ;;  %s1125_s29 = sadd.s32 1, %s1028_s22  }
  0x11   : > { %s90_s5 = ssub.s32 %s1028_s22, %s1125_s29  ;;  %s93_s7 = sadd.s32 1, %s1024_s21 }
  0x12   : > { %p845_p10 = pneg %p1117_p8  ;;  %p1135_p12 = scmp.eq.s32.totalorder %s90_s5, 0 }
  0x13   : > { %p100_p13 = scmp.ne.s32.totalorder %s1024_s21, %s1020_s20  ;;  %s913_s8 = scalar_lea.vmem %s157_s27, 16 }
  0x14   : > { %p1129_p11 = pnand %p845_p10, %p1617_p1  ;;  %p914_p0 = scmp.ne.s32.totalorder %s157_s27, %s913_s8 }
  0x15   : > { %p921_p9 = scmp.lt.s32.totalorder %s157_s27, %s157_s27  ;;  %p922_p2 = scmp.lt.s32.totalorder %s913_s8, %s913_s8 }
  0x16   : > { %p915_p3 = pneg %p1129_p11 }
  0x17   : > { %p923_p10 = por %p922_p2, %p921_p9 }
  0x18   : > { %p916_p5 = pnand %p915_p3, %p914_p0 }
  0x1a   : > { %p917_p7 = pneg %p916_p5 }
  0x1c   : > { %p924_p1 = pnand %p923_p10, %p917_p7 }
  0x1e   : > { %927 = shalt.err (!%p924_p1)
}
  0x1f   : > { %s1030_s9 = smov [#allocation6]   ;;  %p101_p2 = scmp.eq.s32.totalorder %s1028_s22, 0 }
  0x20   : > { %848 = dma.vmem_to_smem (!%p1129_p11), %s157_s27, 16, %s1030_s9, [#allocation9]  }
  0x21   : > { %s1149_s10 = scalar_select %p1135_p12, %s1024_s21, %s93_s7  }
  0x22   : > { %p1625_p1 = scmp.eq.s32.totalorder %s1095_s1, 1  ;;  %p858_p0 = scmp.lt.s32.totalorder %s1028_s22, 2 }
  0x23   : > { %s173_s12 = sand.u32 1, %s1024_s21   ;;  %p102_p3 = por %p101_p2, %p100_p13 }
  0x24   : > { %p1157_p9 = por %p1625_p1, %p100_p13  ;;  %s795_s13 = sshll.u32 %s173_s12, 3 }
  0x25   : > { %s835_s14 = sshll.u32 %s1028_s22, 7  ;;  %s177_s18 = scalar_lea.vmem [#allocation10], %s795_s13 }
  0x26   : > { %s1626_s11 = scalar_select %p1157_p9, 1, 0 }
  0x27   : > { %s1170_s17 = scalar_lea.hbm %s1615_s3, %s835_s14  ;;  %s185_s2 = sshll.u32 %s177_s18, 4  ;;  %s1176_s2 = int_to_ptr.vmem [resolvable:$true] %s185_s2 }
  0x28   : > { %p1172_p11 = pnand %p858_p0, %p102_p3  ;;  %s174_s26 = scalar_lea.sflag [#allocation7], %s173_s12 }
  0x29   : > { %s928_s27 = scalar_lea.hbm %s1170_s17, 128  ;;  %s933_s6 = scalar_lea.hbm %s1615_s3, 256 }
  0x2a   : > { %p929_p12 = scmp.ne.s32.totalorder %s1170_s17, %s928_s27  ;;  %p930_p13 = pneg %p1172_p11 }
  0x2b   : > { %p934_p10 = scmp.lt.u32.totalorder %s1170_s17, %s1615_s3  ;;  %p935_p2 = scmp.lt.u32.totalorder %s933_s6, %s928_s27 }
  0x2c   : > { %p931_p5 = pnand %p930_p13, %p929_p12  ;;  %p937_p0 = scmp.lt.u32.totalorder %s928_s27, %s1170_s17 }
  0x2d   : > { %p936_p1 = por %p935_p2, %p934_p10 }
  0x2e   : > { %p932_p7 = pneg %p931_p5 }
  0x2f   : > { %p938_p3 = por %p937_p0, %p936_p1 }
  0x31   : > { %p939_p6 = pnand %p938_p3, %p932_p7 }
  0x33   : > { %942 = shalt.err (!%p939_p6)
}
  0x34   : > { %s943_s9 = scalar_lea.vmem %s1176_s2, 128  ;;  %s1031_s12 = smov [#allocation10]  }
  0x35   : > { %p944_p12 = scmp.ne.s32.totalorder %s1176_s2, %s943_s9  ;;  %s948_s13 = sshll.u32 %s1031_s12, 4  ;;  %s949_s13 = int_to_ptr.vmem [resolvable:$false] %s948_s13 }
  0x36   : > { %s950_s14 = scalar_lea.vmem %s949_s13, 256  ;;  %p951_p4 = scmp.lt.s32.totalorder %s1176_s2, %s949_s13 }
  0x37   : > { %p946_p5 = pnand %p944_p12, %p930_p13  ;;  %p952_p10 = scmp.lt.s32.totalorder %s950_s14, %s943_s9 }
  0x39   : > { %p947_p9 = pneg %p946_p5  ;;  %p953_p2 = por %p952_p10, %p951_p4 }
  0x3b   : > { %p954_p1 = pnand %p953_p2, %p947_p9 }
  0x3d   : > { %957 = shalt.err (!%p954_p1)
}
  0x3e   : > { %852 = dma.hbm_to_vmem [thread:$0]  (!%p1172_p11), %s1170_s17, 128, %s1176_s2, %s174_s26  }
  0x3f   : > { %194 = sbr.rel (%p1117_p8) target bundleno = 460 (0x1cc), region = 36  ;;  %p1628_p6 = scmp.eq.s32.totalorder (!%p1117_p8), %s1095_s1, 0 }
  0x46   : > { %1003 = dma.done.wait (%p1628_p6), [#allocation9], 16   ;;  %p1629_p13 = pmov %p1628_p6 }
  0x47   : > { %s1210_s15 = sand.u32 1, %s1020_s20   ;;  %p1630_p4 = scmp.ne.s32.totalorder %s1620_s23, 0 }
  0x48   : > { %1005 = vsyncadd (%p1629_p13), [#allocation9], 4294967280  ;;  %s800_s16 = sshll.u32 %s1210_s15, 3  ;;  %s201_s18 = scalar_lea.sflag [#allocation7], %s1210_s15 }
  0x49   : > { %s204_s17 = scalar_lea.vmem [#allocation10], %s800_s16 }
  0x4a   : > { %1007 = dma.done.wait (%p1630_p4), %s201_s18, 128  }
  0x4b   : > { %1009 = vsyncadd (%p1630_p4), %s201_s18, 4294967168 }
  0x4c   : > { %209 = sfence }
  0x4d   : > { %v1220_v0 = vld [vmem:[%s204_s17] sm:$0xff]  ;;  %vm231_vm0 = vcmask 134144   ;;  %vm233_vm1 = vcmask 273544   ;;  %s1032_s28 = smov 17   ;;  %v1033_v1 = vmov 0.0   ;;  %vm243_vm2 = vcmask 1043592  }
  0x4e   : > { %236 = vrot.lane.b32.xlu0 %v1220_v0, %s1032_s28  ;;  %232 = vst.msk [vmem:[#allocation2] sm:$0xf] %vm231_vm0, %v1033_v1  ;;  %vm244_vm3 = vcmask 1047556   ;;  %vm239_vm4 = vcmask 138240   ;;  %s1225_s23 = sld [smem:[#allocation6 + $0x4]]  ;;  %s1034_s2 = smov 110   ;;  %v248_v8 = vlaneseq }
  0x4f   : > { %234 = vst.msk [vmem:[#allocation2 + $0x8] sm:$0xf] %vm233_vm1, %v1033_v1  ;;  %vm245_vm5 = vmor %vm244_vm3, %vm243_vm2  ;;  %s1035_s25 = smov 126   ;;  %s1231_s26 = sld [smem:[#allocation6 + $0x13]]  ;;  %vm293_vm9 = vcmask 1031168   ;;  %vm319_vm12 = vcmask 900096  }
  0x50   : > { %s1036_s27 = smov 96   ;;  %s1037_s30 = smov 112   ;;  %vm630_vm6 = vcmp.lt.s32.totalorder %v248_v8, 256  ;;  %v249_v59 = vand.u32 127, %v248_v8  ;;  %vm306_vm13 = vcmask 916480   ;;  %vm332_vm14 = vcmask 785408  }
  0x51   : > { %s1240_s5 = sld [smem:[#allocation6 + $0x7]]  ;;  %s1038_s6 = smov 94   ;;  %632 = vst.msk [vmem:[#allocation3] ss:$8 sm:$0x3] %vm630_vm6, %v1033_v1  ;;  %vm345_vm15 = vcmask 769024  }
  0x52   : > { %635 = vst.msk [vmem:[#allocation3 + $0x5] ss:$8 sm:$0x3] %vm630_vm6, %v1033_v1  ;;  %s1039_s7 = smov 111   ;;  %s802_s8 = sld [smem:[#allocation6 + $0x1]]  ;;  %v250_v62 = vadd.s32 128, %v249_v59 }
  0x53   : > { %s1040_s9 = smov 127   ;;  %s823_s12 = sld [smem:[#allocation6 + $0x16]]  ;;  %vm401_vm1 = vcmask 908288   ;;  %vm433_vm2 = vcmask 777216  }
  0x54   : > { %v389_v7 = vstv %s1225_s23  ;;  %s1041_s13 = smov 95   ;;  %s826_s14 = sld [smem:[#allocation6 + $0x19]] }
  0x55   : > { %v542_v10 = vstv %s1231_s26  ;;  %s811_s18 = sld [smem:[#allocation6 + $0xa]]  ;;  %s814_s17 = sld [smem:[#allocation6 + $0xd]] }
  0x56   : > { %s817_s28 = sld [smem:[#allocation6 + $0x10]]  ;;  %s1351_s26 = sld [smem:[#allocation6 + $0x2]] }
  0x57   : > { %v421_v12 = vstv %s1240_s5  ;;  %s352_s23 = sld [smem:[#allocation6]]  ;;  %s1365_s5 = sld [smem:[#allocation6 + $0x5]] }
  0x58   : > { %v357_v15 = vstv %s802_s8  ;;  %s1380_s8 = sld [smem:[#allocation6 + $0x3]]  ;;  %p1639_p9 = scmp.ne.s32.totalorder %s1626_s11, 0 }
  0x59   : > { %v573_v17 = vstv %s823_s12  ;;  %s1384_s12 = sld [smem:[#allocation6 + $0x8]] }
  0x5a   : > { %v604_v23 = vstv %s826_s14  ;;  %s1483_s14 = sld [smem:[#allocation6 + $0xc]] }
  0x5b   : > { %v451_v28 = vstv %s811_s18  ;;  %v482_v35 = vstv %s814_s17  ;;  %s1485_s18 = sld [smem:[#allocation6 + $0x1a]]  ;;  %s1504_s17 = sld [smem:[#allocation6 + $0xe]] }
  0x5c   : > { %v513_v40 = vstv %s817_s28  ;;  %s1512_s28 = sld [smem:[#allocation6 + $0xf]] }
  0xc0   : > { %v237_v2 = vpop.permute.xlu0 %236 }
  0xc1   : > { %v238_v3 = vrot.slane %v237_v2, 4 }
  0xc3   : > { %v240_v4 = vsel %vm239_vm4, %v238_v3, %v237_v2  ;;  %247 = vst.msk [vmem:[#allocation2 + $0x8] sm:$0xf] %vm231_vm0, %v238_v3  ;;  %v255_v2 = vand.u32 15, %v249_v59  ;;  %v262_v3 = vand.u32 15, %v250_v62  ;;  %vm369_vm0 = vcmask 1039360  }
  0xc4   : > { %246 = vst.msk [vmem:[#allocation2] sm:$0xff] %vm245_vm5, %v240_v4 }
  0xc5   : > { %vm1353_vm7 = vcmp.ge.s32.totalorder %v255_v2, 1  ;;  %vm1361_vm8 = vcmp.ge.s32.totalorder %v262_v3, 1  ;;  %vm1394_vm10 = vcmp.le.s32.totalorder %v255_v2, 14  ;;  %vm1398_vm11 = vcmp.le.s32.totalorder %v262_v3, 14 }
  0xca   : > { %v1223_v5 = vld [vmem:[#allocation2 + $0x8] sm:$0xf] }
  0xcb   : > { %317 = vrot.lane.b32.xlu0 %v1223_v5, %s1034_s2  ;;  %291 = vrot.lane.b32.xlu1 %v1223_v5, %s1035_s25  ;;  %v1237_v6 = vld [vmem:[#allocation2] sm:$0xff]  ;;  %v391_v9 = vmul.f32 %v389_v7, %v1223_v5  ;;  %v544_v11 = vmul.f32 %v542_v10, %v1223_v5  ;;  %v423_v13 = vmul.f32 %v421_v12, %v1223_v5 }
  0xcc   : > { %v1263_v14 = vcombine.high %v1237_v6, %v1237_v6  ;;  %v359_v16 = vmul.f32 %v357_v15, %v1223_v5  ;;  %v575_v18 = vmul.f32 %v573_v17, %v1223_v5  ;;  %v390_v19 = vmul.f32 %v389_v7, %v1237_v6 }
  0xcd   : > { %v358_v20 = vmul.f32 %v357_v15, %v1237_v6  ;;  %v543_v21 = vmul.f32 %v542_v10, %v1237_v6  ;;  %v574_v22 = vmul.f32 %v573_v17, %v1237_v6  ;;  %v605_v24 = vmul.f32 %v604_v23, %v1237_v6 }
  0xce   : > { %v422_v25 = vmul.f32 %v421_v12, %v1237_v6  ;;  %v394_v26 = vcombine.high %v390_v19, %v390_v19  ;;  %v452_v30 = vmul.f32 %v451_v28, %v1237_v6  ;;  %v453_v32 = vmul.f32 %v451_v28, %v1223_v5 }
  0xcf   : > { %330 = vrot.lane.b32.xlu0 %v1223_v5, %s1036_s27  ;;  %304 = vrot.lane.b32.xlu1 %v1223_v5, %s1037_s30  ;;  %v362_v27 = vcombine.high %v358_v20, %v358_v20  ;;  %v547_v29 = vcombine.high %v543_v21, %v543_v21  ;;  %v606_v33 = vmul.f32 %v604_v23, %v1223_v5  ;;  %v353_v12 = vstv %s352_s23  ;;  %s1541_s23 = sld [smem:[#allocation6 + $0x11]] }
  0xd0   : > { %v426_v31 = vcombine.high %v422_v25, %v422_v25  ;;  %v578_v34 = vcombine.high %v574_v22, %v574_v22  ;;  %v456_v36 = vcombine.high %v452_v30, %v452_v30  ;;  %v483_v37 = vmul.f32 %v482_v35, %v1237_v6 }
  0xd1   : > { %v609_v39 = vcombine.high %v605_v24, %v605_v24  ;;  %v514_v41 = vmul.f32 %v513_v40, %v1237_v6  ;;  %v484_v42 = vmul.f32 %v482_v35, %v1223_v5  ;;  %v515_v43 = vmul.f32 %v513_v40, %v1223_v5 }
  0xd2   : > { %v487_v38 = vcombine.high %v483_v37, %v483_v37 }
  0xd3   : > { %343 = vrot.lane.b32.xlu0 %v1223_v5, %s1038_s6  ;;  %300 = vrot.lane.b32.xlu1 %v1237_v6, %s1037_s30  ;;  %v518_v44 = vcombine.high %v514_v41, %v514_v41 }
  0xd7   : > { %399 = vrot.lane.b32.xlu1 %v391_v9, %s1039_s7  ;;  %287 = vrot.lane.b32.xlu0 %v1237_v6, %s1035_s25 }
  0xdb   : > { %552 = vrot.lane.b32.xlu1 %v544_v11, %s1040_s9  ;;  %313 = vrot.lane.b32.xlu0 %v1237_v6, %s1034_s2  ;;  %v283_v11 = vsel %vm1353_vm7, %v1237_v6, 0.0 }
  0xdc   : > { %v354_v17 = vmul.f32 %v353_v12, %v283_v11 }
  0xdf   : > { %431 = vrot.lane.b32.xlu1 %v423_v13, %s1041_s13  ;;  %326 = vrot.lane.b32.xlu0 %v1237_v6, %s1036_s27  ;;  %v284_v13 = vsel %vm1361_vm8, %v1263_v14, 0.0 }
  0xe3   : > { %339 = vrot.lane.b32.xlu0 %v1237_v6, %s1038_s6  ;;  %289 = vrot.lane.b32.xlu1 %v1263_v14, %s1035_s25  ;;  %s1345_s25 = sld [smem:[#allocation6 + $0x9]] }
  0xe7   : > { %367 = vrot.lane.b32.xlu0 %v359_v16, %s1040_s9  ;;  %315 = vrot.lane.b32.xlu1 %v1263_v14, %s1034_s2  ;;  %s819_s2 = sld [smem:[#allocation6 + $0x12]] }
  0xe9   : > { %v447_v16 = vstv %s1345_s25  ;;  %s671_s25 = sld [smem:[#allocation5]] }
  0xeb   : > { %583 = vrot.lane.b32.xlu0 %v575_v18, %s1039_s7  ;;  %395 = vrot.lane.b32.xlu1 %v390_v19, %s1039_s7  ;;  %v355_v19 = vmul.f32 %v353_v12, %v284_v13 }
  0xed   : > { %v538_v15 = vstv %s819_s2  ;;  %s667_s2 = sld [smem:[#allocation4]] }
  0xef   : > { %363 = vrot.lane.b32.xlu0 %v358_v20, %s1040_s9  ;;  %328 = vrot.lane.b32.xlu1 %v1263_v14, %s1036_s27  ;;  %s1357_s27 = sld [smem:[#allocation6 + $0xb]]  ;;  %v1390_v20 = vmul.f32 %v538_v15, %v284_v13 }
  0xf3   : > { %302 = vrot.lane.b32.xlu0 %v1263_v14, %s1037_s30  ;;  %548 = vrot.lane.b32.xlu1 %v543_v21, %s1040_s9  ;;  %s1359_s30 = sld [smem:[#allocation6 + $0x14]]  ;;  %v1392_v21 = vmul.f32 %v447_v16, %v283_v11 }
  0xf5   : > { %v470_v28 = vstv %s1357_s27  ;;  %s229_s27 = scalar_lea.vmem [#allocation11], %s800_s16  ;;  %s1042_s16 = smov [#allocation11]  }
  0xf7   : > { %579 = vrot.lane.b32.xlu0 %v574_v22, %s1039_s7  ;;  %341 = vrot.lane.b32.xlu1 %v1263_v14, %s1038_s6  ;;  %s1367_s6 = sld [smem:[#allocation6 + $0x17]]  ;;  %v1388_v14 = vmul.f32 %v538_v15, %v283_v11 }
  0xfb   : > { %610 = vrot.lane.b32.xlu0 %v605_v24, %s1041_s13  ;;  %427 = vrot.lane.b32.xlu1 %v422_v25, %s1041_s13 }
  0xff   : > { %397 = vrot.lane.b32.xlu0 %v394_v26, %s1039_s7  ;;  %365 = vrot.lane.b32.xlu1 %v362_v27, %s1040_s9  ;;  %v377_v26 = vstv %s1351_s26  ;;  %v1403_v27 = vmul.f32 %v447_v16, %v284_v13  ;;  %s836_s26 = sshll.u32 %s1095_s1, 7 }
 0x103   : > { %550 = vrot.lane.b32.xlu0 %v547_v29, %s1040_s9  ;;  %457 = vrot.lane.b32.xlu1 %v452_v30, %s1040_s9  ;;  %v561_v29 = vstv %s1359_s30  ;;  %v409_v30 = vstv %s1365_s5  ;;  %s709_s30 = sshll.u32 %s229_s27, 4  ;;  %s1570_s30 = int_to_ptr.vmem [resolvable:$true] %s709_s30 }
 0x104   : > { %s958_s1 = scalar_lea.vmem %s1570_s30, 128 }
 0x105   : > { %p959_p8 = scmp.ne.s32.totalorder %s1570_s30, %s958_s1 }
 0x107   : > { %429 = vrot.lane.b32.xlu0 %v426_v31, %s1041_s13  ;;  %461 = vrot.lane.b32.xlu1 %v453_v32, %s1040_s9  ;;  %v592_v31 = vstv %s1367_s6  ;;  %p960_p11 = pnand %p959_p8, %p1639_p9 }
 0x109   : > { %p961_p7 = pneg %p960_p11 }
 0x10b   : > { %614 = vrot.lane.b32.xlu0 %v606_v33, %s1041_s13  ;;  %581 = vrot.lane.b32.xlu1 %v578_v34, %s1039_s7 }
 0x10f   : > { %459 = vrot.lane.b32.xlu0 %v456_v36, %s1040_s9  ;;  %488 = vrot.lane.b32.xlu1 %v483_v37, %s1039_s7  ;;  %s1382_s9 = sld [smem:[#allocation6 + $0x15]] }
 0x113   : > { %490 = vrot.lane.b32.xlu0 %v487_v38, %s1039_s7  ;;  %612 = vrot.lane.b32.xlu1 %v609_v39, %s1041_s13 }
 0x117   : > { %519 = vrot.lane.b32.xlu0 %v514_v41, %s1041_s13  ;;  %492 = vrot.lane.b32.xlu1 %v484_v42, %s1039_s7  ;;  %s1369_s7 = sld [smem:[#allocation6 + $0x6]]  ;;  %v383_v41 = vstv %s1380_s8  ;;  %v567_v42 = vstv %s1382_s9  ;;  %s695_s8 = scalar_lea.sflag [#allocation8], %s1210_s15 }
 0x118   : > { %s962_s9 = sshll.u32 %s1042_s16, 4  ;;  %s963_s9 = int_to_ptr.vmem [resolvable:$false] %s962_s9 }
 0x119   : > { %p965_p0 = scmp.lt.s32.totalorder %s1570_s30, %s963_s9 }
 0x11b   : > { %523 = vrot.lane.b32.xlu0 %v515_v43, %s1041_s13  ;;  %521 = vrot.lane.b32.xlu1 %v518_v44, %s1041_s13  ;;  %s1449_s13 = sld [smem:[#allocation6 + $0x18]] }
 0x11d   : > { %v415_v34 = vstv %s1369_s7  ;;  %s1568_s7 = scalar_lea.hbm %s1616_s4, %s836_s26 }
 0x13d   : > { %v1316_v45 = vpop.permute.xlu0 %317  ;;  %v292_v46 = vpop.permute.xlu1 %291 }
 0x141   : > { %v1318_v47 = vpop.permute.xlu0 %330  ;;  %v1320_v48 = vpop.permute.xlu1 %304 }
 0x145   : > { %v1322_v49 = vpop.permute.xlu0 %343  ;;  %v1324_v50 = vpop.permute.xlu1 %300 }
 0x149   : > { %v1326_v51 = vpop.permute.xlu1 %399  ;;  %v288_v52 = vpop.permute.xlu0 %287 }
 0x14d   : > { %v1328_v53 = vpop.permute.xlu1 %552  ;;  %v1330_v54 = vpop.permute.xlu0 %313 }
 0x151   : > { %v1332_v55 = vpop.permute.xlu1 %431  ;;  %v1334_v56 = vpop.permute.xlu0 %326 }
 0x155   : > { %v1336_v57 = vpop.permute.xlu0 %339  ;;  %v290_v58 = vpop.permute.xlu1 %289 }
 0x156   : > { %v294_v24 = vsel %vm293_vm9, %v288_v52, %v290_v58  ;;  %v295_v25 = vsel %vm293_vm9, %v290_v58, %v292_v46  ;;  %v441_v46 = vstv %s1384_s12  ;;  %s964_s12 = scalar_lea.vmem %s963_s9, 256 }
 0x157   : > { %v1411_v32 = vsel %vm1394_vm10, %v294_v24, 0.0  ;;  %v1415_v33 = vsel %vm1398_vm11, %v295_v25, 0.0  ;;  %p966_p3 = scmp.lt.s32.totalorder %s964_s12, %s958_s1 }
 0x158   : > { %v378_v43 = vmul.f32 %v377_v26, %v1411_v32  ;;  %v379_v44 = vmul.f32 %v377_v26, %v1415_v33  ;;  %v562_v59 = vmul.f32 %v561_v29, %v1411_v32 }
 0x159   : > { %v1339_v60 = vpop.permute.xlu0 %367  ;;  %v316_v61 = vpop.permute.xlu1 %315  ;;  %p967_p12 = por %p966_p3, %p965_p0 }
 0x15a   : > { %v320_v37 = vsel %vm319_vm12, %v1330_v54, %v316_v61  ;;  %v321_v38 = vsel %vm319_vm12, %v316_v61, %v1316_v45  ;;  %v563_v61 = vmul.f32 %v561_v29, %v1415_v33 }
 0x15b   : > { %v1433_v52 = vsel %vm1394_vm10, %v320_v37, 0.0  ;;  %v1437_v45 = vsel %vm1398_vm11, %v321_v38, 0.0  ;;  %p968_p5 = pnand %p967_p12, %p961_p7 }
 0x15c   : > { %v410_v13 = vmul.f32 %v409_v30, %v1433_v52  ;;  %v411_v15 = vmul.f32 %v409_v30, %v1437_v45 }
 0x15d   : > { %v1341_v63 = vpop.permute.xlu0 %583  ;;  %v1343_v1 = vpop.permute.xlu1 %395 }
 0x161   : > { %v1347_v4 = vpop.permute.xlu0 %363  ;;  %v1349_v5 = vpop.permute.xlu1 %328 }
 0x162   : > { %v333_v3 = vsel %vm332_vm14, %v1334_v56, %v1349_v5 }
 0x165   : > { %v303_v9 = vpop.permute.xlu0 %302  ;;  %v1371_v10 = vpop.permute.xlu1 %548 }
 0x166   : > { %v307_v39 = vsel %vm306_vm13, %v1324_v50, %v303_v9  ;;  %v308_v40 = vsel %vm306_vm13, %v303_v9, %v1320_v48  ;;  %v334_v9 = vsel %vm332_vm14, %v1349_v5, %v1318_v47  ;;  %v1471_v5 = vsel %vm1353_vm7, %v333_v3, 0.0 }
 0x167   : > { %v1441_v48 = vsel %vm1353_vm7, %v307_v39, 0.0  ;;  %v1445_v50 = vsel %vm1361_vm8, %v308_v40, 0.0  ;;  %v598_v40 = vstv %s1449_s13 }
 0x168   : > { %v384_v16 = vmul.f32 %v383_v41, %v1441_v48 }
 0x169   : > { %v1386_v18 = vpop.permute.xlu0 %579  ;;  %v342_v6 = vpop.permute.xlu1 %341 }
 0x16a   : > { %v347_v56 = vsel %vm345_vm15, %v342_v6, %v1322_v49 }
 0x16b   : > { %v1493_v8 = vsel %vm1398_vm11, %v347_v56, 0.0  ;;  %v472_v56 = vmul.f32 %v470_v28, %v1415_v33 }
 0x16d   : > { %v1418_v35 = vpop.permute.xlu0 %610  ;;  %v1420_v36 = vpop.permute.xlu1 %427 }
 0x171   : > { %v398_v54 = vpop.permute.xlu0 %397  ;;  %v366_v58 = vpop.permute.xlu1 %365 }
 0x172   : > { %v370_v62 = vsel %vm369_vm0, %v1347_v4, %v366_v58  ;;  %v371_v2 = vsel %vm369_vm0, %v366_v58, %v1339_v60  ;;  %v385_v4 = vmul.f32 %v383_v41, %v1445_v50  ;;  %v346_v60 = vsel %vm345_vm15, %v1336_v57, %v342_v6 }
 0x173   : > { %v374_v11 = vadd.f32 %v370_v62, %v354_v17  ;;  %v375_v12 = vadd.f32 %v371_v2, %v355_v19  ;;  %v1475_v17 = vsel %vm1361_vm8, %v334_v9, 0.0  ;;  %v1489_v7 = vsel %vm1394_vm10, %v346_v60, 0.0 }
 0x174   : > { %v416_v41 = vmul.f32 %v415_v34, %v1471_v5  ;;  %v417_v23 = vmul.f32 %v415_v34, %v1475_v17  ;;  %v594_v58 = vmul.f32 %v592_v31, %v1437_v45  ;;  %v443_v34 = vmul.f32 %v441_v46, %v1493_v8 }
 0x175   : > { %v380_v24 = vadd.f32 %v378_v43, %v374_v11  ;;  %v381_v25 = vadd.f32 %v379_v44, %v375_v12  ;;  %v551_v26 = vpop.permute.xlu0 %550  ;;  %v458_v47 = vpop.permute.xlu1 %457  ;;  %v568_v43 = vmul.f32 %v567_v42, %v1441_v48  ;;  %v471_v60 = vmul.f32 %v470_v28, %v1411_v32 }
 0x176   : > { %v554_v19 = vsel %vm369_vm0, %v1371_v10, %v551_v26  ;;  %v555_v57 = vsel %vm369_vm0, %v551_v26, %v1328_v53  ;;  %v402_v53 = vsel %vm401_vm1, %v1343_v1, %v398_v54  ;;  %v403_v10 = vsel %vm401_vm1, %v398_v54, %v1326_v51 }
 0x177   : > { %v386_v29 = vadd.f32 %v384_v16, %v380_v24  ;;  %v387_v49 = vadd.f32 %v385_v4, %v381_v25  ;;  %v558_v6 = vadd.f32 %v554_v19, %v1388_v14  ;;  %v559_v30 = vadd.f32 %v555_v57, %v1390_v20 }
 0x178   : > { %v569_v1 = vmul.f32 %v567_v42, %v1445_v50  ;;  %v593_v54 = vmul.f32 %v592_v31, %v1433_v52  ;;  %v623_v24 = vstv %s1485_s18  ;;  %v599_v57 = vmul.f32 %v598_v40, %v1471_v5 }
 0x179   : > { %v564_v14 = vadd.f32 %v562_v59, %v558_v6  ;;  %v565_v20 = vadd.f32 %v563_v61, %v559_v30  ;;  %v430_v37 = vpop.permute.xlu0 %429  ;;  %v406_v38 = vadd.f32 %v402_v53, %v386_v29  ;;  %v407_v39 = vadd.f32 %v403_v10, %v387_v49  ;;  %v462_v22 = vpop.permute.xlu1 %461 }
 0x17a   : > { %v442_v59 = vmul.f32 %v441_v46, %v1489_v7  ;;  %v434_v11 = vsel %vm433_vm2, %v1420_v36, %v430_v37  ;;  %v435_v31 = vsel %vm433_vm2, %v430_v37, %v1332_v55  ;;  %v476_v36 = vstv %s1483_s14 }
 0x17b   : > { %v412_v44 = vadd.f32 %v410_v13, %v406_v38  ;;  %v413_v51 = vadd.f32 %v411_v15, %v407_v39  ;;  %v570_v2 = vadd.f32 %v568_v43, %v564_v14  ;;  %v571_v9 = vadd.f32 %v569_v1, %v565_v20 }
 0x17c   : > { %v600_v29 = vmul.f32 %v598_v40, %v1475_v17  ;;  %v501_v53 = vstv %s1504_s17  ;;  %v507_v10 = vstv %s1512_s28  ;;  %v477_v14 = vmul.f32 %v476_v36, %v1441_v48 }
 0x17d   : > { %v418_v61 = vadd.f32 %v416_v41, %v412_v44  ;;  %v419_v42 = vadd.f32 %v417_v23, %v413_v51  ;;  %v615_v62 = vpop.permute.xlu0 %614  ;;  %v582_v3 = vpop.permute.xlu1 %581  ;;  %v478_v40 = vmul.f32 %v476_v36, %v1445_v50  ;;  %v625_v48 = vmul.f32 %v623_v24, %v1493_v8 }
 0x17e   : > { %v585_v12 = vsel %vm401_vm1, %v1386_v18, %v582_v3  ;;  %v586_v46 = vsel %vm401_vm1, %v582_v3, %v1341_v63  ;;  %v502_v44 = vmul.f32 %v501_v53, %v1433_v52 }
 0x17f   : > { %v438_v13 = vadd.f32 %v434_v11, %v418_v61  ;;  %v439_v15 = vadd.f32 %v435_v31, %v419_v42  ;;  %v589_v16 = vadd.f32 %v585_v12, %v570_v2  ;;  %v590_v4 = vadd.f32 %v586_v46, %v571_v9 }
 0x180   : > { %v508_v42 = vmul.f32 %v507_v10, %v1471_v5  ;;  %v532_v31 = vstv %s1541_s23  ;;  %v509_v46 = vmul.f32 %v507_v10, %v1475_v17 }
 0x181   : > { %v444_v55 = vadd.f32 %v442_v59, %v438_v13  ;;  %v445_v25 = vadd.f32 %v443_v34, %v439_v15  ;;  %v595_v18 = vadd.f32 %v593_v54, %v589_v16  ;;  %v596_v26 = vadd.f32 %v594_v58, %v590_v4  ;;  %v460_v19 = vpop.permute.xlu0 %459  ;;  %v489_v63 = vpop.permute.xlu1 %488 }
 0x182   : > { %v463_v49 = vsel %vm369_vm0, %v458_v47, %v460_v19  ;;  %v464_v32 = vsel %vm369_vm0, %v460_v19, %v462_v22  ;;  %v533_v5 = vmul.f32 %v532_v31, %v1489_v7 }
 0x183   : > { %v639_v6 = vrot.slane %v444_v55, 7  ;;  %v640_v28 = vrot.slane %v445_v25, 7  ;;  %v467_v33 = vadd.f32 %v463_v49, %v1392_v21  ;;  %v468_v30 = vadd.f32 %v464_v32, %v1403_v27 }
 0x184   : > { %v601_v47 = vadd.f32 %v599_v57, %v595_v18  ;;  %v602_v22 = vadd.f32 %v600_v29, %v596_v26  ;;  %v624_v21 = vmul.f32 %v623_v24, %v1489_v7  ;;  %v534_v24 = vmul.f32 %v532_v31, %v1493_v8 }
 0x185   : > { %643 = vst [vmem:[#allocation3] sm:$0x1e] %v639_v6  ;;  %644 = vst [vmem:[#allocation3 + $0x8] sm:$0x1e] %v640_v28  ;;  %v473_v20 = vadd.f32 %v471_v60, %v467_v33  ;;  %v474_v37 = vadd.f32 %v472_v56, %v468_v30  ;;  %v491_v38 = vpop.permute.xlu0 %490  ;;  %v613_v39 = vpop.permute.xlu1 %612  ;;  %v668_v49 = vstv %s667_s2 }
 0x186   : > { %v616_v27 = vsel %vm433_vm2, %v1418_v35, %v613_v39  ;;  %v617_v41 = vsel %vm433_vm2, %v613_v39, %v615_v62  ;;  %v494_v51 = vsel %vm401_vm1, %v489_v63, %v491_v38  ;;  %v503_v35 = vmul.f32 %v501_v53, %v1437_v45 }
 0x187   : > { %v479_v23 = vadd.f32 %v477_v14, %v473_v20  ;;  %v620_v43 = vadd.f32 %v616_v27, %v601_v47  ;;  %v621_v1 = vadd.f32 %v617_v41, %v602_v22  ;;  %v480_v61 = vadd.f32 %v478_v40, %v474_v37 }
 0x188   : > { %v684_v20 = vstv %s671_s25 }
 0x189   : > { %v498_v54 = vadd.f32 %v494_v51, %v479_v23  ;;  %v626_v58 = vadd.f32 %v624_v21, %v620_v43  ;;  %v627_v50 = vadd.f32 %v625_v48, %v621_v1  ;;  %v520_v59 = vpop.permute.xlu0 %519  ;;  %v493_v34 = vpop.permute.xlu1 %492 }
 0x18a   : > { %v495_v62 = vsel %vm401_vm1, %v491_v38, %v493_v34 }
 0x18b   : > { %v504_v2 = vadd.f32 %v502_v44, %v498_v54  ;;  %v649_v3 = vrot.slane %v626_v58, 7  ;;  %v650_v9 = vrot.slane %v627_v50, 7  ;;  %v499_v11 = vadd.f32 %v495_v62, %v480_v61 }
 0x18c   : > { %v645_v52 = vld [vmem:[#allocation3] sm:$0xf]  ;;  %v646_v12 = vld [vmem:[#allocation3 + $0x8] sm:$0xf] }
 0x18d   : > { %v505_v13 = vadd.f32 %v503_v35, %v499_v11  ;;  %v524_v15 = vpop.permute.xlu0 %523  ;;  %v510_v16 = vadd.f32 %v508_v42, %v504_v2  ;;  %653 = vst [vmem:[#allocation3] sm:$0x1e] %v649_v3  ;;  %v522_v4 = vpop.permute.xlu1 %521  ;;  %654 = vst [vmem:[#allocation3 + $0x8] sm:$0x1e] %v650_v9 }
 0x18e   : > { %v525_v45 = vsel %vm433_vm2, %v520_v59, %v522_v4  ;;  %v526_v36 = vsel %vm433_vm2, %v522_v4, %v524_v15 }
 0x18f   : > { %v511_v60 = vadd.f32 %v509_v46, %v505_v13  ;;  %v529_v56 = vadd.f32 %v525_v45, %v510_v16 }
 0x191   : > { %v530_v55 = vadd.f32 %v526_v36, %v511_v60  ;;  %v535_v25 = vadd.f32 %v533_v5, %v529_v56 }
 0x193   : > { %v536_v17 = vadd.f32 %v534_v24, %v530_v55  ;;  %v657_v63 = vadd.f32 %v645_v52, %v535_v25 }
 0x194   : > { %v655_v18 = vld [vmem:[#allocation3] sm:$0x3c]  ;;  %v656_v26 = vld [vmem:[#allocation3 + $0x8] sm:$0x3c] }
 0x195   : > { %v661_v19 = vrot.slane %v655_v18, 2  ;;  %v658_v57 = vadd.f32 %v646_v12, %v536_v17  ;;  %v662_v29 = vrot.slane %v656_v26, 2 }
 0x197   : > { %v665_v32 = vadd.f32 %v661_v19, %v657_v63  ;;  %v666_v6 = vadd.f32 %v662_v29, %v658_v57 }
 0x199   : > { %v669_v28 = vadd.f32 %v668_v49, %v665_v32  ;;  %v670_v7 = vadd.f32 %v668_v49, %v666_v6 }
 0x19b   : > { %v828_v33 = vmul.f32 -1.442695, %v669_v28  ;;  %v829_v30 = vmul.f32 -1.442695, %v670_v7 }
 0x19d   : > { %905 = vpow2.f32 %v828_v33 }
 0x19e   : > { %907 = vpow2.f32 %v829_v30 }
 0x1a7   : > { %v906_v8 = vpop.eup %905 }
 0x1a8   : > { %v908_v53 = vpop.eup %907  ;;  %v678_v10 = vadd.f32 1.0, %v906_v8 }
 0x1a9   : > { %v679_v14 = vadd.f32 1.0, %v908_v53 }
 0x1aa   : > { %909 = vrcp.f32 %v678_v10 }
 0x1ab   : > { %911 = vrcp.f32 %v679_v14 }
 0x1b4   : > { %v910_v37 = vpop.eup %909 }
 0x1b5   : > { %v912_v38 = vpop.eup %911  ;;  %v685_v47 = vmul.f32 %v910_v37, %v684_v20 }
 0x1b6   : > { %v686_v39 = vmul.f32 %v912_v38, %v684_v20 }
 0x1b8   : > { %v689_v22 = vcombine.low %v685_v47, %v686_v39 }
 0x1ba   : > { %v691_v40 = vmul.f32 %v689_v22, %v1220_v0 }
 0x1bc   : > { %v692_v21 = vadd.f32 %v691_v40, %v1220_v0 }
 0x1be   : > { %693 = vst [vmem:[%s229_s27] sm:$0xff] %v692_v21 }
 0x1bf   : > { %971 = shalt.err (!%p968_p5)
}
 0x1c0   : > { %s972_s15 = scalar_lea.hbm %s1568_s7, 128  ;;  %s976_s18 = scalar_lea.hbm %s1616_s4, 256 }
 0x1c1   : > { %p973_p10 = scmp.ne.s32.totalorder %s1568_s7, %s972_s15  ;;  %p977_p6 = scmp.lt.u32.totalorder %s1568_s7, %s1616_s4 }
 0x1c2   : > { %p978_p13 = scmp.lt.u32.totalorder %s976_s18, %s972_s15  ;;  %p980_p8 = scmp.lt.u32.totalorder %s972_s15, %s1568_s7 }
 0x1c3   : > { %p974_p2 = pnand %p973_p10, %p1639_p9 }
 0x1c4   : > { %p979_p4 = por %p978_p13, %p977_p6 }
 0x1c5   : > { %p975_p1 = pneg %p974_p2 }
 0x1c6   : > { %p981_p11 = por %p980_p8, %p979_p4 }
 0x1c8   : > { %p982_p7 = pnand %p981_p11, %p975_p1 }
 0x1ca   : > { %985 = shalt.err (!%p982_p7)
}
 0x1cb   : > { %843 = dma.vmem_to_hbm [thread:$0]  (%p1639_p9), %s1570_s30, 128, %s1568_s7, %s695_s8  }
 0x1cc PF: > { %s721_s23 = sand.u32 1, %s1016_s19   ;;  %p1640_p0 = scmp.ne.s32.totalorder %s1621_s24, 0 }
 0x1cd   : > { %p1641_p3 = scmp.ge.s32.totalorder %s1028_s22, 2  ;;  %s722_s2 = scalar_lea.sflag [#allocation8], %s721_s23 }
 0x1cf   : > { %p854_p12 = pnand %p1641_p3, %p1640_p0 }
 0x1d1   : > { %1011 = dma.done.wait (!%p854_p12), %s722_s2, 128  }
 0x1d2   : > { %1013 = vsyncadd (!%p854_p12), %s722_s2, 4294967168  ;;  %p20_p5 = scmp.ge.s32.totalorder %s1125_s29, 4   ;;  %s1642_s19 = smov %s1020_s20 }
 0x1d3   : > { %s1643_s20 = smov %s1024_s21  ;;  %s1644_s21 = smov %s1149_s10 }
 0x1d4   : > { %s1645_s22 = smov %s1125_s29  ;;  %22 = sbr.rel (!%p20_p5) target bundleno = 9 (0x9), region = 87 }
 0x1db   :  { %727 = vsyncpa [#allocation7], 1 }
 0x1dc   :  { %729 = vsyncpa [#allocation7 + $0x1], 1 }
 0x1dd   :  { %730 = vsyncpa [#allocation8], 1 }
 0x1de   :  { %732 = vsyncpa [#allocation8 + $0x1], 1 }
 0x1df   :  { %733 = vsyncpa [#allocation9], 1 }
 0x1e0   :  { %735 = vsyncpa [#allocation9 + $0x1], 1 }

</bundles_post_ra>
